<compile_context>
chip_gen: v7x
topology: tpu7x:2x2x1
jax: 0.10.0
libtpu: 0.0.40
codegen_flags: <defaults>
</compile_context>

<pallas_src>
import jax
import jax.numpy as jnp
from jax.experimental import pallas as pl
from jax.experimental.pallas import tpu as pltpu


def _round_up(n, m):
    return ((n + m - 1) // m) * m


def decoder_t_kernel(x_ref,
                     w0_ref, b0_ref,
                     w1_ref, b1_ref,
                     w2_ref, b2_ref,
                     w3_ref, b3_ref,
                     wo_ref, bo_ref,
                     out_ref):
    """Fused 5-layer MLP: fc0 -> relu(fc1) -> relu(fc2) -> relu(fc3) -> relu(Xout)."""

    def linear(h, w_ref, b_ref):
        w = w_ref[...]
        # Cast the activation to the weight dtype (no-op in the f32 path); accumulate in f32.
        return jnp.dot(h.astype(w.dtype), w,
                       preferred_element_type=jnp.float32) + b_ref[...]

    h = linear(x_ref[...], w0_ref, b0_ref)            # fc0: linear, no activation
    h = jnp.maximum(linear(h, w1_ref, b1_ref), 0.0)   # relu(fc1)
    h = jnp.maximum(linear(h, w2_ref, b2_ref), 0.0)   # relu(fc2)
    h = jnp.maximum(linear(h, w3_ref, b3_ref), 0.0)   # relu(fc3)
    y = jnp.maximum(linear(h, wo_ref, bo_ref), 0.0)   # relu(Xout)
    out_ref[...] = y.astype(out_ref.dtype)


def decoder_t_forward(x, params, *, tile_b=256, compute_dtype=jnp.float32):
    """Wrapper: pads to lane-aligned shapes, tiles over batch (1 step for small B)."""
    (w0, b0), (w1, b1), (w2, b2), (w3, b3), (wo, bo) = params
    B, in_dim = x.shape
    int_dim = w0.shape[1]
    out_dim = wo.shape[1]

    # Lane/sublane-friendly padded dims.
    int_pad = _round_up(int_dim, 128)          # hidden width -> lane-dense matmuls
    out_pad = _round_up(out_dim, 128)          # output lane dim -> unmasked stores
    tile_b = min(tile_b, _round_up(B, 8))      # small B => a single grid step
    B_pad = _round_up(B, tile_b)

    cdt = jnp.dtype(compute_dtype)

    def pad2(a, rows, cols, dtype):
        return jnp.pad(a, ((0, rows - a.shape[0]), (0, cols - a.shape[1]))).astype(dtype)

    x_p = pad2(x, B_pad, in_dim, cdt)
    w0p = pad2(w0, in_dim, int_pad, cdt)
    w1p = pad2(w1, int_pad, int_pad, cdt)
    w2p = pad2(w2, int_pad, int_pad, cdt)
    w3p = pad2(w3, int_pad, int_pad, cdt)
    wop = pad2(wo, int_pad, out_pad, cdt)
    b0p = pad2(b0, 1, int_pad, jnp.float32)
    b1p = pad2(b1, 1, int_pad, jnp.float32)
    b2p = pad2(b2, 1, int_pad, jnp.float32)
    b3p = pad2(b3, 1, int_pad, jnp.float32)
    bop = pad2(bo, 1, out_pad, jnp.float32)

    grid = (B_pad // tile_b,)

    def invariant(shape):
        # Grid-invariant block (whole array every step). Constant index_map => Pallas
        # does not re-fetch it on subsequent grid steps.
        return pl.BlockSpec(shape, lambda i: (0,) * len(shape))

    in_specs = [
        pl.BlockSpec((tile_b, in_dim), lambda i: (i, 0)),   # x tile
        invariant(w0p.shape), invariant(b0p.shape),
        invariant(w1p.shape), invariant(b1p.shape),
        invariant(w2p.shape), invariant(b2p.shape),
        invariant(w3p.shape), invariant(b3p.shape),
        invariant(wop.shape), invariant(bop.shape),
    ]
    out_specs = pl.BlockSpec((tile_b, out_pad), lambda i: (i, 0))

    operands = (x_p, w0p, b0p, w1p, b1p, w2p, b2p, w3p, b3p, wop, bop)
    bytes_accessed = sum(int(a.size) * a.dtype.itemsize for a in operands)
    bytes_accessed += B_pad * out_pad * 4
    cost = pl.CostEstimate(
        flops=2 * B_pad * (in_dim * int_pad + 3 * int_pad * int_pad + int_pad * out_pad),
        transcendentals=0,
        bytes_accessed=bytes_accessed,
    )

    out_padded = pl.pallas_call(
        decoder_t_kernel,
        out_shape=jax.ShapeDtypeStruct((B_pad, out_pad), jnp.float32),
        grid_spec=pltpu.PrefetchScalarGridSpec(
            num_scalar_prefetch=0,
            grid=grid,
            in_specs=in_specs,
            out_specs=out_specs,
        ),
        compiler_params=pltpu.CompilerParams(
            dimension_semantics=("parallel",),   # batch axis shards across v7x's 2 TCs
        ),
        cost_estimate=cost,
    )(*operands)

    return out_padded[:B, :out_dim]


def init_linear(key, in_features, out_features):
    """PyTorch-style uniform(-1/sqrt(fan_in), 1/sqrt(fan_in)) init.
    Weight already transposed to [in, out] (kernel layout); bias [1, out]."""
    kw, kb = jax.random.split(key)
    bound = 1.0 / jnp.sqrt(jnp.float32(in_features))
    w = jax.random.uniform(kw, (in_features, out_features), jnp.float32, -bound, bound)
    b = jax.random.uniform(kb, (1, out_features), jnp.float32, -bound, bound)
    return w, b


def reference_forward(x, params):
    """Plain-JAX reference mirroring the PyTorch forward."""
    (w0, b0), (w1, b1), (w2, b2), (w3, b3), (wo, bo) = params
    h = x @ w0 + b0
    h = jax.nn.relu(h @ w1 + b1)
    h = jax.nn.relu(h @ w2 + b2)
    h = jax.nn.relu(h @ w3 + b3)
    return jax.nn.relu(h @ wo + bo)


if __name__ == "__main__":
    # Module defaults: in_dim=3, int_dim=50, out_dim=1000. Small batch.
    B, in_dim, int_dim, out_dim = 16, 3, 50, 1000

    key = jax.random.PRNGKey(0)
    kx, k0, k1, k2, k3, ko = jax.random.split(key, 6)

    x = jax.random.normal(kx, (B, in_dim), jnp.float32)
    params = (
        init_linear(k0, in_dim, int_dim),
        init_linear(k1, int_dim, int_dim),
        init_linear(k2, int_dim, int_dim),
        init_linear(k3, int_dim, int_dim),
        init_linear(ko, int_dim, out_dim),
    )

    ref = jax.block_until_ready(reference_forward(x, params))

    # f32 path: B=16 runs in one grid step; exact vs. reference.
    out_f32 = jax.block_until_ready(decoder_t_forward(x, params))
    assert out_f32.shape == (B, out_dim)
    assert jnp.allclose(out_f32, ref, atol=1e-4, rtol=1e-4), "f32 mismatch vs reference"

    # bf16 matmul operands (v6e/v7x MXU-friendly), f32 accumulation and biases.
    out_bf16 = jax.block_until_ready(
        decoder_t_forward(x, params, compute_dtype=jnp.bfloat16))
    assert out_bf16.shape == (B, out_dim)
    assert jnp.allclose(out_bf16, ref, atol=5e-2, rtol=5e-2), "bf16 mismatch vs reference"

    print("KERNEL_OK")
</pallas_src>

<mosaic_0001>
module attributes {stable_mosaic.version = 11 : i64} {
  func.func @decoder_t_kernel(%arg0: i32, %arg1: memref<16x3xf32, #tpu.memory_space<vmem>>, %arg2: memref<3x128xf32, #tpu.memory_space<vmem>>, %arg3: memref<1x128xf32, #tpu.memory_space<vmem>>, %arg4: memref<128x128xf32, #tpu.memory_space<vmem>>, %arg5: memref<1x128xf32, #tpu.memory_space<vmem>>, %arg6: memref<128x128xf32, #tpu.memory_space<vmem>>, %arg7: memref<1x128xf32, #tpu.memory_space<vmem>>, %arg8: memref<128x128xf32, #tpu.memory_space<vmem>>, %arg9: memref<1x128xf32, #tpu.memory_space<vmem>>, %arg10: memref<128x1024xf32, #tpu.memory_space<vmem>>, %arg11: memref<1x1024xf32, #tpu.memory_space<vmem>>, %arg12: memref<16x1024xf32, #tpu.memory_space<vmem>>) attributes {dimension_semantics = [#tpu.dimension_semantics<parallel>], iteration_bounds = array<i64: 1>, scalar_prefetch = 0 : i64, scratch_operands = 0 : i64, tpu.core_type = #tpu.core_type<tc>, window_params = [{transform_indices = @transform_0, window_bounds = array<i64: 16, 3>}, {pipeline_mode = #tpu.pipeline_mode<synchronous>, transform_indices = @transform_1, window_bounds = array<i64: 3, 128>}, {pipeline_mode = #tpu.pipeline_mode<synchronous>, transform_indices = @transform_2, window_bounds = array<i64: 1, 128>}, {pipeline_mode = #tpu.pipeline_mode<synchronous>, transform_indices = @transform_3, window_bounds = array<i64: 128, 128>}, {pipeline_mode = #tpu.pipeline_mode<synchronous>, transform_indices = @transform_4, window_bounds = array<i64: 1, 128>}, {pipeline_mode = #tpu.pipeline_mode<synchronous>, transform_indices = @transform_5, window_bounds = array<i64: 128, 128>}, {pipeline_mode = #tpu.pipeline_mode<synchronous>, transform_indices = @transform_6, window_bounds = array<i64: 1, 128>}, {pipeline_mode = #tpu.pipeline_mode<synchronous>, transform_indices = @transform_7, window_bounds = array<i64: 128, 128>}, {pipeline_mode = #tpu.pipeline_mode<synchronous>, transform_indices = @transform_8, window_bounds = array<i64: 1, 128>}, {pipeline_mode = #tpu.pipeline_mode<synchronous>, transform_indices = @transform_9, window_bounds = array<i64: 128, 1024>}, {pipeline_mode = #tpu.pipeline_mode<synchronous>, transform_indices = @transform_10, window_bounds = array<i64: 1, 1024>}, {transform_indices = @transform_11, window_bounds = array<i64: 16, 1024>}]} {
    %c0 = arith.constant 0 : index
    %c0_0 = arith.constant 0 : index
    %0 = vector.load %arg1[%c0, %c0_0] : memref<16x3xf32, #tpu.memory_space<vmem>>, vector<16x3xf32>
    %c0_1 = arith.constant 0 : index
    %c0_2 = arith.constant 0 : index
    %1 = vector.load %arg2[%c0_1, %c0_2] : memref<3x128xf32, #tpu.memory_space<vmem>>, vector<3x128xf32>
    %cst = arith.constant dense<0.000000e+00> : vector<16x128xf32>
    %2 = tpu.matmul %0, %1, %cst {dimension_numbers = #tpu.dot_dimension_numbers<[1], [0], [0], [1], [0, 0, 1, 1], [], []>} : vector<16x3xf32>, vector<3x128xf32>, vector<16x128xf32> -> vector<16x128xf32>
    %c0_3 = arith.constant 0 : index
    %c0_4 = arith.constant 0 : index
    %3 = vector.load %arg3[%c0_3, %c0_4] : memref<1x128xf32, #tpu.memory_space<vmem>>, vector<1x128xf32>
    %4 = vector.broadcast %3 : vector<1x128xf32> to vector<16x128xf32>
    %5 = arith.addf %2, %4 : vector<16x128xf32>
    %c0_5 = arith.constant 0 : index
    %c0_6 = arith.constant 0 : index
    %6 = vector.load %arg4[%c0_5, %c0_6] : memref<128x128xf32, #tpu.memory_space<vmem>>, vector<128x128xf32>
    %cst_7 = arith.constant dense<0.000000e+00> : vector<16x128xf32>
    %7 = tpu.matmul %5, %6, %cst_7 {dimension_numbers = #tpu.dot_dimension_numbers<[1], [0], [0], [1], [0, 0, 1, 1], [], []>} : vector<16x128xf32>, vector<128x128xf32>, vector<16x128xf32> -> vector<16x128xf32>
    %c0_8 = arith.constant 0 : index
    %c0_9 = arith.constant 0 : index
    %8 = vector.load %arg5[%c0_8, %c0_9] : memref<1x128xf32, #tpu.memory_space<vmem>>, vector<1x128xf32>
    %9 = vector.broadcast %8 : vector<1x128xf32> to vector<16x128xf32>
    %10 = arith.addf %7, %9 : vector<16x128xf32>
    %cst_10 = arith.constant 0.000000e+00 : f32
    %11 = vector.broadcast %cst_10 : f32 to vector<16x128xf32>
    %12 = arith.maximumf %10, %11 : vector<16x128xf32>
    %c0_11 = arith.constant 0 : index
    %c0_12 = arith.constant 0 : index
    %13 = vector.load %arg6[%c0_11, %c0_12] : memref<128x128xf32, #tpu.memory_space<vmem>>, vector<128x128xf32>
    %cst_13 = arith.constant dense<0.000000e+00> : vector<16x128xf32>
    %14 = tpu.matmul %12, %13, %cst_13 {dimension_numbers = #tpu.dot_dimension_numbers<[1], [0], [0], [1], [0, 0, 1, 1], [], []>} : vector<16x128xf32>, vector<128x128xf32>, vector<16x128xf32> -> vector<16x128xf32>
    %c0_14 = arith.constant 0 : index
    %c0_15 = arith.constant 0 : index
    %15 = vector.load %arg7[%c0_14, %c0_15] : memref<1x128xf32, #tpu.memory_space<vmem>>, vector<1x128xf32>
    %16 = vector.broadcast %15 : vector<1x128xf32> to vector<16x128xf32>
    %17 = arith.addf %14, %16 : vector<16x128xf32>
    %cst_16 = arith.constant 0.000000e+00 : f32
    %18 = vector.broadcast %cst_16 : f32 to vector<16x128xf32>
    %19 = arith.maximumf %17, %18 : vector<16x128xf32>
    %c0_17 = arith.constant 0 : index
    %c0_18 = arith.constant 0 : index
    %20 = vector.load %arg8[%c0_17, %c0_18] : memref<128x128xf32, #tpu.memory_space<vmem>>, vector<128x128xf32>
    %cst_19 = arith.constant dense<0.000000e+00> : vector<16x128xf32>
    %21 = tpu.matmul %19, %20, %cst_19 {dimension_numbers = #tpu.dot_dimension_numbers<[1], [0], [0], [1], [0, 0, 1, 1], [], []>} : vector<16x128xf32>, vector<128x128xf32>, vector<16x128xf32> -> vector<16x128xf32>
    %c0_20 = arith.constant 0 : index
    %c0_21 = arith.constant 0 : index
    %22 = vector.load %arg9[%c0_20, %c0_21] : memref<1x128xf32, #tpu.memory_space<vmem>>, vector<1x128xf32>
    %23 = vector.broadcast %22 : vector<1x128xf32> to vector<16x128xf32>
    %24 = arith.addf %21, %23 : vector<16x128xf32>
    %cst_22 = arith.constant 0.000000e+00 : f32
    %25 = vector.broadcast %cst_22 : f32 to vector<16x128xf32>
    %26 = arith.maximumf %24, %25 : vector<16x128xf32>
    %c0_23 = arith.constant 0 : index
    %c0_24 = arith.constant 0 : index
    %27 = vector.load %arg10[%c0_23, %c0_24] : memref<128x1024xf32, #tpu.memory_space<vmem>>, vector<128x1024xf32>
    %cst_25 = arith.constant dense<0.000000e+00> : vector<16x1024xf32>
    %28 = tpu.matmul %26, %27, %cst_25 {dimension_numbers = #tpu.dot_dimension_numbers<[1], [0], [0], [1], [0, 0, 1, 1], [], []>} : vector<16x128xf32>, vector<128x1024xf32>, vector<16x1024xf32> -> vector<16x1024xf32>
    %c0_26 = arith.constant 0 : index
    %c0_27 = arith.constant 0 : index
    %29 = vector.load %arg11[%c0_26, %c0_27] : memref<1x1024xf32, #tpu.memory_space<vmem>>, vector<1x1024xf32>
    %30 = vector.broadcast %29 : vector<1x1024xf32> to vector<16x1024xf32>
    %31 = arith.addf %28, %30 : vector<16x1024xf32>
    %cst_28 = arith.constant 0.000000e+00 : f32
    %32 = vector.broadcast %cst_28 : f32 to vector<16x1024xf32>
    %33 = arith.maximumf %31, %32 : vector<16x1024xf32>
    %c0_29 = arith.constant 0 : index
    %c0_30 = arith.constant 0 : index
    %34 = vector.load %arg12[%c0_29, %c0_30] : memref<16x1024xf32, #tpu.memory_space<vmem>>, vector<16x1024xf32>
    tpu.vector_store %arg12[%c0_29, %c0_30], %33 {strides = array<i32>} : memref<16x1024xf32, #tpu.memory_space<vmem>>, vector<16x1024xf32>,
    return
  }
  func.func @transform_0(%arg0: i32) -> (i32, i32) {
    %c0_i32 = arith.constant 0 : i32
    %c0_i32_0 = arith.constant 0 : i32
    return %arg0, %c0_i32 : i32, i32
  }
  func.func @transform_1(%arg0: i32) -> (i32, i32) {
    %c0_i32 = arith.constant 0 : i32
    %c0_i32_0 = arith.constant 0 : i32
    %c0_i32_1 = arith.constant 0 : i32
    return %c0_i32, %c0_i32_0 : i32, i32
  }
  func.func @transform_2(%arg0: i32) -> (i32, i32) {
    %c0_i32 = arith.constant 0 : i32
    %c0_i32_0 = arith.constant 0 : i32
    %c0_i32_1 = arith.constant 0 : i32
    return %c0_i32, %c0_i32_0 : i32, i32
  }
  func.func @transform_3(%arg0: i32) -> (i32, i32) {
    %c0_i32 = arith.constant 0 : i32
    %c0_i32_0 = arith.constant 0 : i32
    %c0_i32_1 = arith.constant 0 : i32
    return %c0_i32, %c0_i32_0 : i32, i32
  }
  func.func @transform_4(%arg0: i32) -> (i32, i32) {
    %c0_i32 = arith.constant 0 : i32
    %c0_i32_0 = arith.constant 0 : i32
    %c0_i32_1 = arith.constant 0 : i32
    return %c0_i32, %c0_i32_0 : i32, i32
  }
  func.func @transform_5(%arg0: i32) -> (i32, i32) {
    %c0_i32 = arith.constant 0 : i32
    %c0_i32_0 = arith.constant 0 : i32
    %c0_i32_1 = arith.constant 0 : i32
    return %c0_i32, %c0_i32_0 : i32, i32
  }
  func.func @transform_6(%arg0: i32) -> (i32, i32) {
    %c0_i32 = arith.constant 0 : i32
    %c0_i32_0 = arith.constant 0 : i32
    %c0_i32_1 = arith.constant 0 : i32
    return %c0_i32, %c0_i32_0 : i32, i32
  }
  func.func @transform_7(%arg0: i32) -> (i32, i32) {
    %c0_i32 = arith.constant 0 : i32
    %c0_i32_0 = arith.constant 0 : i32
    %c0_i32_1 = arith.constant 0 : i32
    return %c0_i32, %c0_i32_0 : i32, i32
  }
  func.func @transform_8(%arg0: i32) -> (i32, i32) {
    %c0_i32 = arith.constant 0 : i32
    %c0_i32_0 = arith.constant 0 : i32
    %c0_i32_1 = arith.constant 0 : i32
    return %c0_i32, %c0_i32_0 : i32, i32
  }
  func.func @transform_9(%arg0: i32) -> (i32, i32) {
    %c0_i32 = arith.constant 0 : i32
    %c0_i32_0 = arith.constant 0 : i32
    %c0_i32_1 = arith.constant 0 : i32
    return %c0_i32, %c0_i32_0 : i32, i32
  }
  func.func @transform_10(%arg0: i32) -> (i32, i32) {
    %c0_i32 = arith.constant 0 : i32
    %c0_i32_0 = arith.constant 0 : i32
    %c0_i32_1 = arith.constant 0 : i32
    return %c0_i32, %c0_i32_0 : i32, i32
  }
  func.func @transform_11(%arg0: i32) -> (i32, i32) {
    %c0_i32 = arith.constant 0 : i32
    %c0_i32_0 = arith.constant 0 : i32
    return %arg0, %c0_i32 : i32, i32
  }
}

</mosaic_0001>

<bundles_post_ra>
// kernel: tpu_custom_call.1
= control target key start
LH: loop header
LB: loop body
LE: loop exit
PB: predicated region body
PF: predicated region fallthrough
CT: control target
= control target key end

     0   :  { %16 = vsyncpa [#allocation3], 0  ;;  %s1800_s0 = inlined_call_operand.vmem [shape: f32[16,3], index: 0, kind: input, shape index: {}]   ;;  %s1801_s1 = inlined_call_operand.vmem [shape: f32[3,128], index: 1, kind: input, shape index: {}]   ;;  %s1802_s2 = inlined_call_operand.vmem [shape: f32[1,128], index: 2, kind: input, shape index: {}]   ;;  %s1803_s3 = inlined_call_operand.hbm [shape: f32[128,128], index: 3, kind: input, shape index: {}]   ;;  %s1804_s4 = inlined_call_operand.vmem [shape: f32[1,128], index: 4, kind: input, shape index: {}]   ;;  %s1805_s5 = inlined_call_operand.hbm [shape: f32[128,128], index: 5, kind: input, shape index: {}]   ;;  %s1806_s6 = inlined_call_operand.vmem [shape: f32[1,128], index: 6, kind: input, shape index: {}]   ;;  %s1807_s7 = inlined_call_operand.hbm [shape: f32[128,128], index: 7, kind: input, shape index: {}]   ;;  %s1808_s8 = inlined_call_operand.vmem [shape: f32[1,128], index: 8, kind: input, shape index: {}]   ;;  %s1809_s9 = inlined_call_operand.hbm [shape: f32[128,1024], index: 9, kind: input, shape index: {}]   ;;  %s1810_s10 = inlined_call_operand.vmem [shape: f32[1,1024], index: 10, kind: input, shape index: {}]   ;;  %s1811_s11 = inlined_call_operand.hbm [shape: f32[16,1024], index: 11, kind: output, shape index: {}]  }
   0x1   :  { %17 = vsyncpa [#allocation6], 0 }
   0x2   :  { %18 = vsyncpa [#allocation9], 0 }
   0x3   :  { %19 = vsyncpa [#allocation4], 0  ;;  %s1561_s17 = smov [#allocation5]   ;;  %s1562_s19 = smov [#allocation2]  }
   0x4   :  { %s45_s18 = sshll.u32 %s1561_s17, 4  ;;  %s31_s20 = sshll.u32 %s1562_s19, 4  ;;  %s46_s18 = int_to_ptr.vmem [resolvable:$true] %s45_s18  ;;  %s1631_s20 = int_to_ptr.vmem [resolvable:$true] %s31_s20 }
   0x5   :  { %s1443_s23 = scalar_lea.hbm %s1805_s5, 2048 }
   0x6   :  { %p1444_p0 = scmp.ne.s32.totalorder %s1805_s5, %s1443_s23  ;;  %p1447_p1 = scmp.lt.u32.totalorder %s1443_s23, %s1805_s5 }
   0x8   :  { %p1449_p2 = pnand %p1447_p1, %p1444_p0 }
   0xa   :  { %1452 = shalt.err (!%p1449_p2)
}
   0xb   :  { %s1453_s28 = scalar_lea.vmem %s46_s18, 2048  ;;  %p1458_p4 = scmp.lt.s32.totalorder %s46_s18, %s46_s18 }
   0xc   :  { %p1454_p3 = scmp.ne.s32.totalorder %s46_s18, %s1453_s28  ;;  %p1459_p5 = scmp.lt.s32.totalorder %s1453_s28, %s1453_s28 }
   0xe   :  { %p1460_p6 = por %p1459_p5, %p1458_p4 }
  0x10   :  { %p1461_p7 = pnand %p1460_p6, %p1454_p3 }
  0x12   :  { %1464 = shalt.err (!%p1461_p7)
}
  0x13   :  { %s1563_s29 = smov 128   ;;  %s1564_s30 = smov 8  }
  0x14   :  { %51 = dma.hbm_to_vmem [thread:$0]  %s1805_s5, 2048, %s46_s18, [#allocation6], %s1563_s29, %s1563_s29, %s1564_s30  }
  0x15   :  { %s1465_s16 = scalar_lea.hbm %s1803_s3, 2048 }
  0x16   :  { %p1466_p8 = scmp.ne.s32.totalorder %s1803_s3, %s1465_s16  ;;  %p1469_p9 = scmp.lt.u32.totalorder %s1465_s16, %s1803_s3 }
  0x18   :  { %p1471_p10 = pnand %p1469_p9, %p1466_p8 }
  0x1a   :  { %1474 = shalt.err (!%p1471_p10)
}
  0x1b   :  { %s1475_s23 = scalar_lea.vmem %s1631_s20, 2048  ;;  %p1480_p12 = scmp.lt.s32.totalorder %s1631_s20, %s1631_s20 }
  0x1c   :  { %p1476_p11 = scmp.ne.s32.totalorder %s1631_s20, %s1475_s23  ;;  %p1481_p13 = scmp.lt.s32.totalorder %s1475_s23, %s1475_s23 }
  0x1e   :  { %p1482_p0 = por %p1481_p13, %p1480_p12 }
  0x20   :  { %p1483_p1 = pnand %p1482_p0, %p1476_p11 }
  0x22   :  { %1486 = shalt.err (!%p1483_p1)
}
  0x23   :  { %37 = dma.hbm_to_vmem [thread:$0]  %s1803_s3, 2048, %s1631_s20, [#allocation3], %s1563_s29, %s1563_s29, %s1564_s30  }
  0x24   :  { %s1565_s24 = smov [#allocation7]   ;;  %s1566_s26 = smov [#allocation8]  }
  0x25   :  { %s59_s25 = sshll.u32 %s1565_s24, 4  ;;  %s73_s27 = sshll.u32 %s1566_s26, 4  ;;  %s60_s25 = int_to_ptr.vmem [resolvable:$true] %s59_s25  ;;  %s1668_s27 = int_to_ptr.vmem [resolvable:$true] %s73_s27 }
  0x26   :  { %s1487_s13 = scalar_lea.hbm %s1807_s7, 2048 }
  0x27   :  { %p1488_p2 = scmp.ne.s32.totalorder %s1807_s7, %s1487_s13  ;;  %p1491_p3 = scmp.lt.u32.totalorder %s1487_s13, %s1807_s7 }
  0x29   :  { %p1493_p4 = pnand %p1491_p3, %p1488_p2 }
  0x2b   :  { %1496 = shalt.err (!%p1493_p4)
}
  0x2c   :  { %s1497_s3 = scalar_lea.vmem %s60_s25, 2048  ;;  %p1502_p6 = scmp.lt.s32.totalorder %s60_s25, %s60_s25 }
  0x2d   :  { %p1498_p5 = scmp.ne.s32.totalorder %s60_s25, %s1497_s3  ;;  %p1503_p7 = scmp.lt.s32.totalorder %s1497_s3, %s1497_s3 }
  0x2f   :  { %p1504_p8 = por %p1503_p7, %p1502_p6 }
  0x31   :  { %p1505_p9 = pnand %p1504_p8, %p1498_p5 }
  0x33   :  { %1508 = shalt.err (!%p1505_p9)
}
  0x34   :  { %65 = dma.hbm_to_vmem [thread:$0]  %s1807_s7, 2048, %s60_s25, [#allocation6], %s1563_s29, %s1563_s29, %s1564_s30  }
  0x35   :  { %s1509_s23 = scalar_lea.hbm %s1809_s9, 16384 }
  0x36   :  { %p1510_p10 = scmp.ne.s32.totalorder %s1809_s9, %s1509_s23  ;;  %p1513_p11 = scmp.lt.u32.totalorder %s1509_s23, %s1809_s9 }
  0x38   :  { %p1515_p12 = pnand %p1513_p11, %p1510_p10 }
  0x3a   :  { %1518 = shalt.err (!%p1515_p12)
}
  0x3b   :  { %s1519_s28 = scalar_lea.vmem %s1668_s27, 16384  ;;  %p1524_p0 = scmp.lt.s32.totalorder %s1668_s27, %s1668_s27 }
  0x3c   :  { %p1520_p13 = scmp.ne.s32.totalorder %s1668_s27, %s1519_s28  ;;  %p1525_p1 = scmp.lt.s32.totalorder %s1519_s28, %s1519_s28 }
  0x3e   :  { %p1526_p2 = por %p1525_p1, %p1524_p0 }
  0x40   :  { %p1527_p3 = pnand %p1526_p2, %p1520_p13 }
  0x42   :  { %1530 = shalt.err (!%p1527_p3)
}
  0x43   :  { %s1567_s7 = smov 1024   ;;  %s1568_s29 = smov 64  }
  0x44   :  { %79 = dma.hbm_to_vmem [thread:$0]  %s1809_s9, 16384, %s1668_s27, [#allocation9], %s1567_s7, %s1567_s7, %s1568_s29  }
  0x45   :  { %1553 = dma.done.wait [#allocation3], 2048  }
  0x46   :  { %1554 = vsyncadd [#allocation3], 4294965248 }
  0x47   :  { %1555 = dma.done.wait [#allocation6], 4096  }
  0x48   :  { %1556 = vsyncadd [#allocation6], 4294963200 }
  0x49   :  { %1557 = dma.done.wait [#allocation9], 16384  }
  0x4a   :  { %1558 = vsyncadd [#allocation9], 4294950912  ;;  %vm111_vm0 = vcmask 1042432   ;;  %vm104_vm1 = vcmask 23552   ;;  %v96_v0 = vld [vmem:[%s1801_s1] sm:$0x7] }
  0x4b   :  { %v94_v1 = vld [vmem:[%s1800_s0] sm:$0xff]  ;;  %v95_v2 = vld [vmem:[%s1800_s0 + $0x8] sm:$0xff]  ;;  %1083 = vmatprep.subr.msk.mxu0 %vm111_vm0, %v96_v0  ;;  %v192_v5 = vld [vmem:[#allocation2 + $0x10] sm:$0xff] }
  0x4c   :  { %1085 = vmatprep.mubr.msk.f32.mxu0 %vm104_vm1, %v94_v1  ;;  %v190_v3 = vld [vmem:[#allocation2] sm:$0xff]  ;;  %v191_v4 = vld [vmem:[#allocation2 + $0x8] sm:$0xff]  ;;  %1084 = vmatpush3.msk.msra.mxu0 %vm111_vm0, %v96_v0  ;;  %v193_v7 = vld [vmem:[#allocation2 + $0x18] sm:$0xff] }
  0x4d   :  { %v1193_v6 = vpack.c.bf16 %v191_v4, %v190_v3  ;;  %1086 = vmatmul.mubr.msk.f32.vlgmr.msra.gmra.mrb[0].mxu0 %vm104_vm1, %v95_v2  ;;  %v1197_v8 = vpack.c.bf16 %v193_v7, %v192_v5  ;;  %v194_v9 = vld [vmem:[#allocation2 + $0x20] sm:$0xff]  ;;  %v195_v10 = vld [vmem:[#allocation2 + $0x28] sm:$0xff]  ;;  %v196_v12 = vld [vmem:[#allocation2 + $0x30] sm:$0xff] }
  0x4e   :  { %v1201_v11 = vpack.c.bf16 %v195_v10, %v194_v9  ;;  %v197_v13 = vld [vmem:[#allocation2 + $0x38] sm:$0xff]  ;;  %v198_v15 = vld [vmem:[#allocation2 + $0x40] sm:$0xff]  ;;  %v199_v16 = vld [vmem:[#allocation2 + $0x48] sm:$0xff] }
  0x4f   :  { %1194 = vmatprep.subr.bf16.mxu1 %v1193_v6  ;;  %v1205_v14 = vpack.c.bf16 %v197_v13, %v196_v12  ;;  %v1209_v17 = vpack.c.bf16 %v199_v16, %v198_v15  ;;  %v200_v18 = vld [vmem:[#allocation2 + $0x50] sm:$0xff]  ;;  %v201_v19 = vld [vmem:[#allocation2 + $0x58] sm:$0xff]  ;;  %v202_v21 = vld [vmem:[#allocation2 + $0x60] sm:$0xff] }
  0x50   :  { %1196 = vmatpush3.bf16.msra.mxu1 %v1193_v6  ;;  %v1213_v20 = vpack.c.bf16 %v201_v19, %v200_v18  ;;  %v203_v22 = vld [vmem:[#allocation2 + $0x68] sm:$0xff]  ;;  %v204_v24 = vld [vmem:[#allocation2 + $0x70] sm:$0xff]  ;;  %v205_v25 = vld [vmem:[#allocation2 + $0x78] sm:$0xff] }
  0x51   :  { %1198 = vmatprep.subr.bf16.mxu1 %v1197_v8  ;;  %v1217_v23 = vpack.c.bf16 %v203_v22, %v202_v21  ;;  %v1221_v26 = vpack.c.bf16 %v205_v25, %v204_v24  ;;  %v290_v27 = vld [vmem:[#allocation5] sm:$0xff]  ;;  %v291_v28 = vld [vmem:[#allocation5 + $0x8] sm:$0xff]  ;;  %v292_v29 = vld [vmem:[#allocation5 + $0x10] sm:$0xff] }
  0x52   :  { %v1225_v30 = vpack.c.bf16 %v291_v28, %v290_v27  ;;  %v293_v31 = vld [vmem:[#allocation5 + $0x18] sm:$0xff]  ;;  %v294_v33 = vld [vmem:[#allocation5 + $0x20] sm:$0xff]  ;;  %v295_v34 = vld [vmem:[#allocation5 + $0x28] sm:$0xff] }
  0x53   :  { %v1229_v32 = vpack.c.bf16 %v293_v31, %v292_v29  ;;  %v1233_v35 = vpack.c.bf16 %v295_v34, %v294_v33  ;;  %v296_v36 = vld [vmem:[#allocation5 + $0x30] sm:$0xff]  ;;  %v297_v37 = vld [vmem:[#allocation5 + $0x38] sm:$0xff]  ;;  %v298_v39 = vld [vmem:[#allocation5 + $0x40] sm:$0xff] }
  0x54   :  { %1200 = vmatpush3.bf16.msra.mxu1 %v1197_v8  ;;  %1226 = vmatprep.subr.bf16.mxu0 %v1225_v30  ;;  %v1237_v38 = vpack.c.bf16 %v297_v37, %v296_v36  ;;  %v299_v40 = vld [vmem:[#allocation5 + $0x48] sm:$0xff]  ;;  %v300_v42 = vld [vmem:[#allocation5 + $0x50] sm:$0xff]  ;;  %v301_v43 = vld [vmem:[#allocation5 + $0x58] sm:$0xff] }
  0x55   :  { %1202 = vmatprep.subr.bf16.mxu1 %v1201_v11  ;;  %1228 = vmatpush3.bf16.msra.mxu0 %v1225_v30  ;;  %v1241_v41 = vpack.c.bf16 %v299_v40, %v298_v39  ;;  %v1245_v44 = vpack.c.bf16 %v301_v43, %v300_v42  ;;  %v302_v45 = vld [vmem:[#allocation5 + $0x60] sm:$0xff]  ;;  %v303_v46 = vld [vmem:[#allocation5 + $0x68] sm:$0xff]  ;;  %v304_v53 = vld [vmem:[#allocation5 + $0x70] sm:$0xff] }
  0x56   :  { %1230 = vmatprep.subr.bf16.mxu0 %v1229_v32  ;;  %v1249_v47 = vpack.c.bf16 %v303_v46, %v302_v45  ;;  %v1019_v48 = vld [vmem:[%s1802_s2] ss:$0 sm:$0xff]  ;;  %v305_v54 = vld [vmem:[#allocation5 + $0x78] sm:$0xff]  ;;  %v391_v57 = vld [vmem:[#allocation7 + $0x8] sm:$0xff] }
  0x57   :  { %v1253_v55 = vpack.c.bf16 %v305_v54, %v304_v53  ;;  %v390_v56 = vld [vmem:[#allocation7] sm:$0xff]  ;;  %v392_v58 = vld [vmem:[#allocation7 + $0x10] sm:$0xff]  ;;  %v393_v60 = vld [vmem:[#allocation7 + $0x18] sm:$0xff] }
  0x58   :  { %1204 = vmatpush3.bf16.msra.mxu1 %v1201_v11  ;;  %v1257_v59 = vpack.c.bf16 %v391_v57, %v390_v56  ;;  %v1261_v61 = vpack.c.bf16 %v393_v60, %v392_v58  ;;  %v394_v62 = vld [vmem:[#allocation7 + $0x20] sm:$0xff]  ;;  %v395_v63 = vld [vmem:[#allocation7 + $0x28] sm:$0xff]  ;;  %v396_v1 = vld [vmem:[#allocation7 + $0x30] sm:$0xff] }
  0x59   :  { %1206 = vmatprep.subr.bf16.mxu1 %v1205_v14  ;;  %1232 = vmatpush3.bf16.msra.mxu0 %v1229_v32  ;;  %v1265_v0 = vpack.c.bf16 %v395_v63, %v394_v62  ;;  %v397_v2 = vld [vmem:[#allocation7 + $0x38] sm:$0xff]  ;;  %v398_v4 = vld [vmem:[#allocation7 + $0x40] sm:$0xff]  ;;  %v399_v5 = vld [vmem:[#allocation7 + $0x48] sm:$0xff] }
  0x5a   :  { %1234 = vmatprep.subr.bf16.mxu0 %v1233_v35  ;;  %v1269_v3 = vpack.c.bf16 %v397_v2, %v396_v1  ;;  %v1273_v6 = vpack.c.bf16 %v399_v5, %v398_v4  ;;  %v400_v7 = vld [vmem:[#allocation7 + $0x50] sm:$0xff]  ;;  %v401_v8 = vld [vmem:[#allocation7 + $0x58] sm:$0xff]  ;;  %v402_v10 = vld [vmem:[#allocation7 + $0x60] sm:$0xff] }
  0x5b   :  { %v1277_v9 = vpack.c.bf16 %v401_v8, %v400_v7  ;;  %v403_v11 = vld [vmem:[#allocation7 + $0x68] sm:$0xff]  ;;  %v1023_v13 = vld [vmem:[%s1804_s4] ss:$0 sm:$0xff]  ;;  %v405_v21 = vld [vmem:[#allocation7 + $0x78] sm:$0xff] }
  0x5c   :  { %1208 = vmatpush3.bf16.msra.mxu1 %v1205_v14  ;;  %v1281_v12 = vpack.c.bf16 %v403_v11, %v402_v10  ;;  %v499_v24 = vld [vmem:[#allocation8 + $0x48] sm:$0xff]  ;;  %v493_v25 = vld [vmem:[#allocation8 + $0x18] sm:$0xff]  ;;  %v490_v28 = vld [vmem:[#allocation8] sm:$0xff] }
  0x5d   :  { %1210 = vmatprep.subr.bf16.mxu1 %v1209_v17  ;;  %1236 = vmatpush3.bf16.msra.mxu0 %v1233_v35  ;;  %v501_v27 = vld [vmem:[#allocation8 + $0x58] sm:$0xff]  ;;  %v498_v29 = vld [vmem:[#allocation8 + $0x40] sm:$0xff]  ;;  %v507_v32 = vld [vmem:[#allocation8 + $0x88] sm:$0xff] }
  0x5e   :  { %1238 = vmatprep.subr.bf16.mxu0 %v1237_v38  ;;  %v1321_v30 = vpack.c.bf16 %v501_v27, %v493_v25  ;;  %v1291_v31 = vpack.c.bf16 %v498_v29, %v490_v28  ;;  %v515_v33 = vld [vmem:[#allocation8 + $0xc8] sm:$0xff]  ;;  %v506_v35 = vld [vmem:[#allocation8 + $0x80] sm:$0xff]  ;;  %v492_v8 = vld [vmem:[#allocation8 + $0x10] sm:$0xff] }
  0x5f   :  { %v1293_v34 = vpack.c.bf16 %v515_v33, %v507_v32  ;;  %v514_v36 = vld [vmem:[#allocation8 + $0xc0] sm:$0xff]  ;;  %v531_v39 = vld [vmem:[#allocation8 + $0x148] sm:$0xff]  ;;  %v509_v11 = vld [vmem:[#allocation8 + $0x98] sm:$0xff] }
  0x60   :  { %1212 = vmatpush3.bf16.msra.mxu1 %v1209_v17  ;;  %v1295_v37 = vpack.c.bf16 %v514_v36, %v506_v35  ;;  %v530_v42 = vld [vmem:[#allocation8 + $0x140] sm:$0xff]  ;;  %v547_v45 = vld [vmem:[#allocation8 + $0x1c8] sm:$0xff]  ;;  %v541_v25 = vld [vmem:[#allocation8 + $0x198] sm:$0xff] }
  0x61   :  { %1214 = vmatprep.subr.bf16.mxu1 %v1213_v20  ;;  %1240 = vmatpush3.bf16.msra.mxu0 %v1237_v38  ;;  %v523_v38 = vld [vmem:[#allocation8 + $0x108] sm:$0xff]  ;;  %v554_v53 = vld [vmem:[#allocation8 + $0x200] sm:$0xff]  ;;  %v540_v29 = vld [vmem:[#allocation8 + $0x190] sm:$0xff] }
  0x62   :  { %1242 = vmatprep.subr.bf16.mxu0 %v1241_v41  ;;  %v1297_v40 = vpack.c.bf16 %v531_v39, %v523_v38  ;;  %v562_v54 = vld [vmem:[#allocation8 + $0x240] sm:$0xff]  ;;  %v571_v56 = vld [vmem:[#allocation8 + $0x288] sm:$0xff]  ;;  %v565_v32 = vld [vmem:[#allocation8 + $0x258] sm:$0xff] }
  0x63   :  { %v579_v57 = vld [vmem:[#allocation8 + $0x2c8] sm:$0xff]  ;;  %v578_v60 = vld [vmem:[#allocation8 + $0x2c0] sm:$0xff]  ;;  %v556_v35 = vld [vmem:[#allocation8 + $0x210] sm:$0xff] }
  0x64   :  { %1216 = vmatpush3.bf16.msra.mxu1 %v1213_v20  ;;  %v404_v20 = vld [vmem:[#allocation7 + $0x70] sm:$0xff]  ;;  %v1309_v58 = vpack.c.bf16 %v579_v57, %v571_v56  ;;  %v587_v62 = vld [vmem:[#allocation8 + $0x308] sm:$0xff]  ;;  %v586_v1 = vld [vmem:[#allocation8 + $0x300] sm:$0xff] }
  0x65   :  { %1218 = vmatprep.subr.bf16.mxu1 %v1217_v23  ;;  %1244 = vmatpush3.bf16.msra.mxu0 %v1241_v41  ;;  %v1285_v22 = vpack.c.bf16 %v405_v21, %v404_v20  ;;  %v522_v41 = vld [vmem:[#allocation8 + $0x100] sm:$0xff]  ;;  %v595_v63 = vld [vmem:[#allocation8 + $0x348] sm:$0xff]  ;;  %v533_v20 = vld [vmem:[#allocation8 + $0x158] sm:$0xff] }
  0x66   :  { %1246 = vmatprep.subr.bf16.mxu0 %v1245_v44  ;;  %v1299_v43 = vpack.c.bf16 %v530_v42, %v522_v41  ;;  %v594_v2 = vld [vmem:[#allocation8 + $0x340] sm:$0xff]  ;;  %v564_v36 = vld [vmem:[#allocation8 + $0x250] sm:$0xff]  ;;  %v581_v38 = vld [vmem:[#allocation8 + $0x2d8] sm:$0xff] }
  0x67   :  { %v1024_v4 = vld [vmem:[%s1806_s6] ss:$0 sm:$0xff]  ;;  %v1339_v39 = vpack.c.bf16 %v564_v36, %v556_v35  ;;  %v572_v41 = vld [vmem:[#allocation8 + $0x290] sm:$0xff] }
  0x68   :  { %1220 = vmatpush3.bf16.msra.mxu1 %v1217_v23  ;;  %v491_v23 = vld [vmem:[#allocation8 + $0x8] sm:$0xff]  ;;  %v580_v42 = vld [vmem:[#allocation8 + $0x2d0] sm:$0xff]  ;;  %v610_v56 = vld [vmem:[#allocation8 + $0x3c0] sm:$0xff] }
  0x69   :  { %1222 = vmatprep.subr.bf16.mxu1 %v1221_v26  ;;  %1248 = vmatpush3.bf16.msra.mxu0 %v1245_v44  ;;  %v539_v44 = vld [vmem:[#allocation8 + $0x188] sm:$0xff] }
  0x6a   :  { %1250 = vmatprep.subr.bf16.mxu0 %v1249_v47  ;;  %v1301_v46 = vpack.c.bf16 %v547_v45, %v539_v44  ;;  %v597_v44 = vld [vmem:[#allocation8 + $0x358] sm:$0xff]  ;;  %v1343_v45 = vpack.c.bf16 %v580_v42, %v572_v41  ;;  %v551_v41 = vld [vmem:[#allocation8 + $0x1e8] sm:$0xff] }
  0x6b   :  { %v545_v42 = vld [vmem:[#allocation8 + $0x1b8] sm:$0xff] }
  0x6c   :  { %1224 = vmatpush3.bf16.msra.mxu1 %v1221_v26  ;;  %v1289_v26 = vpack.c.bf16 %v499_v24, %v491_v23  ;;  %v524_v23 = vld [vmem:[#allocation8 + $0x110] sm:$0xff] }
  0x6d   :  { %1252 = vmatpush3.bf16.msra.mxu0 %v1249_v47  ;;  %1258 = vmatprep.subr.bf16.mxu1 %v1257_v59  ;;  %v538_v47 = vld [vmem:[#allocation8 + $0x180] sm:$0xff]  ;;  %v532_v24 = vld [vmem:[#allocation8 + $0x150] sm:$0xff] }
  0x6e   :  { %1254 = vmatprep.subr.bf16.mxu0 %v1253_v55  ;;  %v1331_v27 = vpack.c.bf16 %v532_v24, %v524_v23  ;;  %v512_v23 = vld [vmem:[#allocation8 + $0xb0] sm:$0xff] }
  0x6f   :  { %v520_v24 = vld [vmem:[#allocation8 + $0xf0] sm:$0xff] }
  0x71   :  { %1256 = vmatpush3.bf16.msra.mxu0 %v1253_v55  ;;  %v1307_v55 = vpack.c.bf16 %v562_v54, %v554_v53  ;;  %v613_v54 = vld [vmem:[#allocation8 + $0x3d8] sm:$0xff] }
  0x72   :  { %1290 = vmatprep.subr.bf16.mxu0 %v1289_v26  ;;  %v549_v26 = vld [vmem:[#allocation8 + $0x1d8] sm:$0xff] }
  0x73   :  { %v1333_v28 = vpack.c.bf16 %v549_v26, %v541_v25  ;;  %v527_v25 = vld [vmem:[#allocation8 + $0x128] sm:$0xff] }
 0x120   :  { %v1087_v49 = vpop.f32.mrb[0].mxu0 }
 0x121   :  { %v181_v50 = vpop.f32.mrb[1].mxu0  ;;  %v187_v52 = vadd.f32 %v1087_v49, %v1019_v48 }
 0x122   :  { %v182_v51 = vadd.f32 %v1019_v48, %v181_v50  ;;  %v546_v48 = vld [vmem:[#allocation8 + $0x1c0] sm:$0xff]  ;;  %v555_v50 = vld [vmem:[#allocation8 + $0x208] sm:$0xff] }
 0x123   :  { %v1303_v49 = vpack.c.bf16 %v546_v48, %v538_v47  ;;  %v588_v47 = vld [vmem:[#allocation8 + $0x310] sm:$0xff] }
 0x124   :  { %1120 = vmatprep.mubr.f32.mxu1 %v182_v51  ;;  %v563_v51 = vld [vmem:[#allocation8 + $0x248] sm:$0xff]  ;;  %v596_v48 = vld [vmem:[#allocation8 + $0x350] sm:$0xff] }
 0x125   :  { %1121 = vmatmul.mubr.f32.vlgmr.msra.gmra.mrb[0].mxu1 %v187_v52  ;;  %v1305_v52 = vpack.c.bf16 %v563_v51, %v555_v50  ;;  %v603_v50 = vld [vmem:[#allocation8 + $0x388] sm:$0xff] }
 0x126   :  { %1260 = vmatpush3.bf16.msra.mxu1 %v1257_v59  ;;  %v570_v59 = vld [vmem:[#allocation8 + $0x280] sm:$0xff]  ;;  %v611_v51 = vld [vmem:[#allocation8 + $0x3c8] sm:$0xff] }
 0x127   :  { %1262 = vmatprep.subr.bf16.mxu1 %v1261_v61  ;;  %v1317_v53 = vpack.c.bf16 %v611_v51, %v603_v50  ;;  %v544_v50 = vld [vmem:[#allocation8 + $0x1b0] sm:$0xff] }
 0x128   :  { %v552_v51 = vld [vmem:[#allocation8 + $0x1f0] sm:$0xff] }
 0x12a   :  { %1264 = vmatpush3.bf16.msra.mxu1 %v1261_v61  ;;  %v1311_v61 = vpack.c.bf16 %v578_v60, %v570_v59  ;;  %v604_v59 = vld [vmem:[#allocation8 + $0x390] sm:$0xff] }
 0x12b   :  { %1266 = vmatprep.subr.bf16.mxu1 %v1265_v0  ;;  %v612_v60 = vld [vmem:[#allocation8 + $0x3d0] sm:$0xff] }
 0x12e   :  { %1268 = vmatpush3.bf16.msra.mxu1 %v1265_v0  ;;  %v1313_v0 = vpack.c.bf16 %v595_v63, %v587_v62  ;;  %v495_v62 = vld [vmem:[#allocation8 + $0x28] sm:$0xff] }
 0x12f   :  { %1270 = vmatprep.subr.bf16.mxu1 %v1269_v3  ;;  %v503_v63 = vld [vmem:[#allocation8 + $0x68] sm:$0xff] }
 0x132   :  { %1272 = vmatpush3.bf16.msra.mxu1 %v1269_v3  ;;  %v1315_v3 = vpack.c.bf16 %v594_v2, %v586_v1  ;;  %v1353_v1 = vpack.c.bf16 %v503_v63, %v495_v62  ;;  %v505_v2 = vld [vmem:[#allocation8 + $0x78] sm:$0xff]  ;;  %v560_v62 = vld [vmem:[#allocation8 + $0x230] sm:$0xff] }
 0x133   :  { %1274 = vmatprep.subr.bf16.mxu1 %v1273_v6  ;;  %v568_v63 = vld [vmem:[#allocation8 + $0x270] sm:$0xff] }
 0x136   :  { %1276 = vmatpush3.bf16.msra.mxu1 %v1273_v6 }
 0x137   :  { %1278 = vmatprep.subr.bf16.mxu1 %v1277_v9 }
 0x13a   :  { %1280 = vmatpush3.bf16.msra.mxu1 %v1277_v9  ;;  %v500_v9 = vld [vmem:[#allocation8 + $0x50] sm:$0xff] }
 0x13b   :  { %1282 = vmatprep.subr.bf16.mxu1 %v1281_v12 }
 0x13e   :  { %1284 = vmatpush3.bf16.msra.mxu1 %v1281_v12  ;;  %v517_v12 = vld [vmem:[#allocation8 + $0xd8] sm:$0xff] }
 0x13f   :  { %1286 = vmatprep.subr.bf16.mxu1 %v1285_v22 }
 0x142   :  { %1288 = vmatpush3.bf16.msra.mxu1 %v1285_v22 }
 0x143   :  { %1322 = vmatprep.subr.bf16.mxu1 %v1321_v30  ;;  %v548_v30 = vld [vmem:[#allocation8 + $0x1d0] sm:$0xff] }
 0x144   :  { %v1335_v33 = vpack.c.bf16 %v548_v30, %v540_v29  ;;  %v529_v29 = vld [vmem:[#allocation8 + $0x138] sm:$0xff] }
 0x145   :  { %v537_v30 = vld [vmem:[#allocation8 + $0x178] sm:$0xff] }
 0x1f8   :  { %v1122_v14 = vpop.f32.mrb[0].mxu1 }
 0x1f9   :  { %v285_v15 = vadd.f32 %v1122_v14, %v1023_v13  ;;  %v279_v16 = vpop.f32.mrb[1].mxu1  ;;  %v1323_v14 = vpack.c.bf16 %v500_v9, %v492_v8  ;;  %v502_v8 = vld [vmem:[#allocation8 + $0x60] sm:$0xff]  ;;  %v496_v9 = vld [vmem:[#allocation8 + $0x30] sm:$0xff] }
 0x1fa   :  { %v280_v17 = vadd.f32 %v1023_v13, %v279_v16  ;;  %v1325_v16 = vpack.c.bf16 %v517_v12, %v509_v11  ;;  %v511_v12 = vld [vmem:[#allocation8 + $0xa8] sm:$0xff] }
 0x1fb   :  { %v289_v19 = vmax.f32 %v285_v15, 0.0 }
 0x1fc   :  { %v288_v18 = vmax.f32 %v280_v17, 0.0  ;;  %v508_v17 = vld [vmem:[#allocation8 + $0x90] sm:$0xff] }
 0x1fe   :  { %1155 = vmatprep.mubr.f32.mxu0 %v288_v18  ;;  %v516_v18 = vld [vmem:[#allocation8 + $0xd0] sm:$0xff] }
 0x1ff   :  { %1156 = vmatmul.mubr.f32.vlgmr.msra.gmra.mrb[2].mxu0 %v289_v19  ;;  %v525_v19 = vld [vmem:[#allocation8 + $0x118] sm:$0xff]  ;;  %v1327_v21 = vpack.c.bf16 %v516_v18, %v508_v17 }
 0x200   :  { %1292 = vmatpush1.bf16.msra.mxu0 %v1291_v31  ;;  %v1329_v22 = vpack.c.bf16 %v533_v20, %v525_v19  ;;  %v557_v31 = vld [vmem:[#allocation8 + $0x218] sm:$0xff]  ;;  %v510_v19 = vld [vmem:[#allocation8 + $0xa0] sm:$0xff] }
 0x201   :  { %1294 = vmatprep.subr.bf16.mxu0 %v1293_v34  ;;  %v1337_v34 = vpack.c.bf16 %v565_v32, %v557_v31  ;;  %v518_v20 = vld [vmem:[#allocation8 + $0xe0] sm:$0xff]  ;;  %v1740_v32 = vpack.c.bf16 %v520_v24, %v512_v23 }
 0x202   :  { %v1359_v31 = vpack.c.bf16 %v518_v20, %v510_v19  ;;  %v598_v23 = vld [vmem:[#allocation8 + $0x360] sm:$0xff] }
 0x204   :  { %1296 = vmatpush1.bf16.msra.mxu0 %v1295_v37  ;;  %v573_v37 = vld [vmem:[#allocation8 + $0x298] sm:$0xff] }
 0x205   :  { %1298 = vmatprep.subr.bf16.mxu0 %v1297_v40  ;;  %v1341_v40 = vpack.c.bf16 %v581_v38, %v573_v37  ;;  %v1746_v37 = vpack.c.bf16 %v537_v30, %v529_v29  ;;  %v528_v38 = vld [vmem:[#allocation8 + $0x130] sm:$0xff]  ;;  %v607_v29 = vld [vmem:[#allocation8 + $0x3a8] sm:$0xff] }
 0x206   :  { %v615_v30 = vld [vmem:[#allocation8 + $0x3e8] sm:$0xff] }
 0x208   :  { %1300 = vmatpush1.bf16.msra.mxu0 %v1299_v43  ;;  %v589_v43 = vld [vmem:[#allocation8 + $0x318] sm:$0xff] }
 0x209   :  { %1302 = vmatprep.subr.bf16.mxu0 %v1301_v46  ;;  %v1345_v46 = vpack.c.bf16 %v597_v44, %v589_v43  ;;  %v553_v43 = vld [vmem:[#allocation8 + $0x1f8] sm:$0xff] }
 0x20c   :  { %1304 = vmatpush1.bf16.msra.mxu0 %v1303_v49  ;;  %v1347_v49 = vpack.c.bf16 %v596_v48, %v588_v47  ;;  %v550_v47 = vld [vmem:[#allocation8 + $0x1e0] sm:$0xff] }
 0x20d   :  { %1306 = vmatprep.subr.bf16.mxu0 %v1305_v52  ;;  %v605_v52 = vld [vmem:[#allocation8 + $0x398] sm:$0xff] }
 0x20e   :  { %v1349_v57 = vpack.c.bf16 %v613_v54, %v605_v52  ;;  %v559_v52 = vld [vmem:[#allocation8 + $0x228] sm:$0xff]  ;;  %v561_v54 = vld [vmem:[#allocation8 + $0x238] sm:$0xff] }
 0x210   :  { %1308 = vmatpush1.bf16.msra.mxu0 %v1307_v55  ;;  %v602_v55 = vld [vmem:[#allocation8 + $0x380] sm:$0xff] }
 0x211   :  { %1310 = vmatprep.subr.bf16.mxu0 %v1309_v58  ;;  %v1319_v58 = vpack.c.bf16 %v610_v56, %v602_v55  ;;  %v569_v55 = vld [vmem:[#allocation8 + $0x278] sm:$0xff] }
 0x214   :  { %1312 = vmatpush1.bf16.msra.mxu0 %v1311_v61  ;;  %v1351_v61 = vpack.c.bf16 %v612_v60, %v604_v59  ;;  %v566_v59 = vld [vmem:[#allocation8 + $0x260] sm:$0xff] }
 0x215   :  { %1314 = vmatprep.subr.bf16.mxu0 %v1313_v0  ;;  %v497_v0 = vld [vmem:[#allocation8 + $0x38] sm:$0xff] }
 0x218   :  { %1316 = vmatpush1.bf16.msra.mxu0 %v1315_v3  ;;  %v1723_v3 = vpack.c.bf16 %v505_v2, %v497_v0  ;;  %v575_v0 = vld [vmem:[#allocation8 + $0x2a8] sm:$0xff]  ;;  %v577_v2 = vld [vmem:[#allocation8 + $0x2b8] sm:$0xff] }
 0x219   :  { %1318 = vmatprep.subr.bf16.mxu0 %v1317_v53  ;;  %v567_v53 = vld [vmem:[#allocation8 + $0x268] sm:$0xff] }
 0x21a   :  { %v1369_v60 = vpack.c.bf16 %v567_v53, %v559_v52 }
 0x21c   :  { %1320 = vmatpush1.bf16.msra.mxu0 %v1319_v58  ;;  %v558_v58 = vld [vmem:[#allocation8 + $0x220] sm:$0xff] }
 0x21d   :  { %1354 = vmatprep.subr.bf16.mxu0 %v1353_v1  ;;  %v583_v1 = vld [vmem:[#allocation8 + $0x2e8] sm:$0xff] }
 0x2d2   :  { %v1157_v5 = vpop.f32.mrb[2].mxu0 }
 0x2d3   :  { %v385_v6 = vadd.f32 %v1157_v5, %v1024_v4  ;;  %v379_v7 = vpop.f32.mrb[3].mxu0  ;;  %v1025_v5 = vld [vmem:[%s1808_s8] ss:$0 sm:$0xff] }
 0x2d4   :  { %v380_v10 = vadd.f32 %v1024_v4, %v379_v7  ;;  %v1569_v4 = vmov 0.0  }
 0x2d5   :  { %v389_v15 = vmax.f32 %v385_v6, 0.0  ;;  %724 = vmatprep.mubr.f32.mxu0 %v1569_v4  ;;  %v494_v6 = vld [vmem:[#allocation8 + $0x20] sm:$0xff] }
 0x2d6   :  { %v388_v13 = vmax.f32 %v380_v10, 0.0  ;;  %v504_v10 = vld [vmem:[#allocation8 + $0x70] sm:$0xff]  ;;  %v1355_v17 = vpack.c.bf16 %v502_v8, %v494_v6  ;;  %v1371_v6 = vpack.c.bf16 %v566_v59, %v558_v58  ;;  %v574_v8 = vld [vmem:[#allocation8 + $0x2a0] sm:$0xff] }
 0x2d7   :  { %v1731_v18 = vpack.c.bf16 %v504_v10, %v496_v9  ;;  %v582_v9 = vld [vmem:[#allocation8 + $0x2e0] sm:$0xff]  ;;  %v1373_v10 = vpack.c.bf16 %v583_v1, %v575_v0 }
 0x2d8   :  { %1190 = vmatprep.mubr.f32.mxu1 %v388_v13  ;;  %v1375_v19 = vpack.c.bf16 %v582_v9, %v574_v8 }
 0x2d9   :  { %1191 = vmatmul.mubr.f32.vlgmr.msra.gmra.mrb[2].mxu1 %v389_v15  ;;  %v513_v15 = vld [vmem:[#allocation8 + $0xb8] sm:$0xff] }
 0x2da   :  { %1324 = vmatpush1.bf16.msra.mxu1 %v1323_v14  ;;  %801 = vmatprep.mubr.f32.mxu1 %v1569_v4  ;;  %v519_v14 = vld [vmem:[#allocation8 + $0xe8] sm:$0xff] }
 0x2db   :  { %1326 = vmatprep.subr.bf16.mxu1 %v1325_v16  ;;  %v521_v16 = vld [vmem:[#allocation8 + $0xf8] sm:$0xff]  ;;  %v1357_v26 = vpack.c.bf16 %v519_v14, %v511_v12  ;;  %v576_v12 = vld [vmem:[#allocation8 + $0x2b0] sm:$0xff]  ;;  %v591_v14 = vld [vmem:[#allocation8 + $0x328] sm:$0xff] }
 0x2de   :  { %1328 = vmatpush1.bf16.msra.mxu1 %v1327_v21 }
 0x2df   :  { %1330 = vmatprep.subr.bf16.mxu1 %v1329_v22 }
 0x2e2   :  { %1332 = vmatpush1.bf16.msra.mxu1 %v1331_v27  ;;  %v1735_v27 = vpack.c.bf16 %v521_v16, %v513_v15  ;;  %v599_v15 = vld [vmem:[#allocation8 + $0x368] sm:$0xff]  ;;  %v593_v16 = vld [vmem:[#allocation8 + $0x338] sm:$0xff] }
 0x2e3   :  { %1334 = vmatprep.subr.bf16.mxu1 %v1333_v28  ;;  %v535_v28 = vld [vmem:[#allocation8 + $0x168] sm:$0xff]  ;;  %v1377_v24 = vpack.c.bf16 %v599_v15, %v591_v14 }
 0x2e4   :  { %v1361_v36 = vpack.c.bf16 %v535_v28, %v527_v25  ;;  %v600_v28 = vld [vmem:[#allocation8 + $0x370] sm:$0xff] }
 0x2e6   :  { %1336 = vmatpush1.bf16.msra.mxu1 %v1335_v33  ;;  %v526_v33 = vld [vmem:[#allocation8 + $0x120] sm:$0xff] }
 0x2e7   :  { %1338 = vmatprep.subr.bf16.mxu1 %v1337_v34  ;;  %v534_v34 = vld [vmem:[#allocation8 + $0x160] sm:$0xff] }
 0x2e8   :  { %v1363_v44 = vpack.c.bf16 %v534_v34, %v526_v33  ;;  %v617_v33 = vld [vmem:[#allocation8 + $0x3f8] sm:$0xff] }
 0x2ea   :  { %1340 = vmatpush1.bf16.msra.mxu1 %v1339_v39  ;;  %v536_v39 = vld [vmem:[#allocation8 + $0x170] sm:$0xff] }
 0x2eb   :  { %1342 = vmatprep.subr.bf16.mxu1 %v1341_v40  ;;  %v543_v40 = vld [vmem:[#allocation8 + $0x1a8] sm:$0xff] }
 0x2ec   :  { %v1365_v48 = vpack.c.bf16 %v551_v41, %v543_v40  ;;  %v614_v41 = vld [vmem:[#allocation8 + $0x3e0] sm:$0xff] }
 0x2ee   :  { %1344 = vmatpush1.bf16.msra.mxu1 %v1343_v45  ;;  %v1752_v45 = vpack.c.bf16 %v536_v39, %v528_v38  ;;  %v606_v38 = vld [vmem:[#allocation8 + $0x3a0] sm:$0xff]  ;;  %v1381_v39 = vpack.c.bf16 %v615_v30, %v607_v29 }
 0x2ef   :  { %1346 = vmatprep.subr.bf16.mxu1 %v1345_v46  ;;  %v542_v46 = vld [vmem:[#allocation8 + $0x1a0] sm:$0xff] }
 0x2f0   :  { %v1367_v56 = vpack.c.bf16 %v550_v47, %v542_v46 }
 0x2f2   :  { %1348 = vmatpush1.bf16.msra.mxu1 %v1347_v49  ;;  %v1755_v49 = vpack.c.bf16 %v553_v43, %v545_v42  ;;  %v608_v42 = vld [vmem:[#allocation8 + $0x3b0] sm:$0xff] }
 0x2f3   :  { %1350 = vmatprep.subr.bf16.mxu1 %v1349_v57  ;;  %v1760_v57 = vpack.c.bf16 %v552_v51, %v544_v50  ;;  %v616_v43 = vld [vmem:[#allocation8 + $0x3f0] sm:$0xff] }
 0x2f4   :  { %v1415_v46 = vpack.c.bf16 %v616_v43, %v608_v42 }
 0x2f6   :  { %1352 = vmatpush1.bf16.msra.mxu1 %v1351_v61  ;;  %v1763_v61 = vpack.c.bf16 %v569_v55, %v561_v54 }
 0x2f7   :  { %1417 = vmatprep.subr.bf16.mxu1 %v1723_v3 }
 0x3ac   :  { %v1192_v7 = vpop.f32.mrb[2].mxu1 }
 0x3ad   :  { %v479_v11 = vpop.f32.mrb[3].mxu1  ;;  %v485_v21 = vadd.f32 %v1192_v7, %v1025_v5  ;;  %v1403_v7 = vpack.c.bf16 %v568_v63, %v560_v62 }
 0x3ae   :  { %v480_v13 = vadd.f32 %v1025_v5, %v479_v11  ;;  %v585_v5 = vld [vmem:[#allocation8 + $0x2f8] sm:$0xff] }
 0x3af   :  { %v1742_v35 = vmax.f32 %v485_v21, 0.0  ;;  %v1405_v11 = vpack.c.bf16 %v585_v5, %v577_v2  ;;  %v590_v21 = vld [vmem:[#allocation8 + $0x320] sm:$0xff] }
 0x3b0   :  { %v1733_v22 = vmax.f32 %v480_v13, 0.0  ;;  %v584_v13 = vld [vmem:[#allocation8 + $0x2f0] sm:$0xff]  ;;  %v1379_v34 = vpack.c.bf16 %v598_v23, %v590_v21 }
 0x3b1   :  { %v1407_v20 = vpack.c.bf16 %v584_v13, %v576_v12 }
 0x3b2   :  { %725 = vmatmul.mubr.f32.vlgmr.msra.gmra.mrb[4].mxu0 %v1733_v22  ;;  %802 = vmatmul.mubr.f32.vlgmr.msra.gmra.mrb[4].mxu1 %v1733_v22 }
 0x3b3   :  { %1356 = vmatpush1.bf16.msra.mxu0 %v1355_v17  ;;  %1425 = vmatpush1.bf16.msra.mxu1 %v1731_v18  ;;  %v601_v17 = vld [vmem:[#allocation8 + $0x378] sm:$0xff] }
 0x3b4   :  { %730 = vmatprep.mubr.f32.mxu0 %v1569_v4  ;;  %807 = vmatprep.mubr.f32.mxu1 %v1569_v4  ;;  %v1409_v25 = vpack.c.bf16 %v601_v17, %v593_v16 }
 0x3b5   :  { %1358 = vmatprep.subr.bf16.mxu0 %v1357_v26  ;;  %1418 = vmatprep.subr.bf16.mxu1 %v1735_v27  ;;  %v592_v26 = vld [vmem:[#allocation8 + $0x330] sm:$0xff] }
 0x3b6   :  { %731 = vmatmul.mubr.f32.gmra.mrb[6].mxu0 %v1742_v35  ;;  %808 = vmatmul.mubr.f32.gmra.mrb[6].mxu1 %v1742_v35 }
 0x3b7   :  { %1360 = vmatpush1.bf16.msra.mxu0 %v1359_v31  ;;  %1426 = vmatpush1.bf16.msra.mxu1 %v1740_v32  ;;  %v609_v31 = vld [vmem:[#allocation8 + $0x3b8] sm:$0xff] }
 0x3b8   :  { %1362 = vmatprep.subr.bf16.mxu0 %v1361_v36  ;;  %1419 = vmatprep.subr.bf16.mxu1 %v1746_v37  ;;  %v1411_v36 = vpack.c.bf16 %v600_v28, %v592_v26  ;;  %v1413_v40 = vpack.c.bf16 %v617_v33, %v609_v31 }
 0x3b9   :  { %878 = vmatprep.mubr.f32.mxu0 %v1569_v4  ;;  %961 = vmatprep.mubr.f32.mxu1 %v1569_v4 }
 0x3bb   :  { %1364 = vmatpush1.bf16.msra.mxu0 %v1363_v44  ;;  %1427 = vmatpush1.bf16.msra.mxu1 %v1752_v45  ;;  %v1383_v44 = vpack.c.bf16 %v614_v41, %v606_v38 }
 0x3bc   :  { %1366 = vmatprep.subr.bf16.mxu0 %v1365_v48  ;;  %1420 = vmatprep.subr.bf16.mxu1 %v1755_v49 }
 0x3bf   :  { %1368 = vmatpush1.bf16.msra.mxu0 %v1367_v56  ;;  %1428 = vmatpush1.bf16.msra.mxu1 %v1760_v57 }
 0x3c0   :  { %1370 = vmatprep.subr.bf16.mxu0 %v1369_v60  ;;  %1421 = vmatprep.subr.bf16.mxu1 %v1763_v61 }
 0x3c3   :  { %1372 = vmatpush1.bf16.msra.mxu0 %v1371_v6  ;;  %1429 = vmatpush1.bf16.msra.mxu1 %v1403_v7 }
 0x3c4   :  { %1374 = vmatprep.subr.bf16.mxu0 %v1373_v10  ;;  %1422 = vmatprep.subr.bf16.mxu1 %v1405_v11 }
 0x3c7   :  { %1376 = vmatpush1.bf16.msra.mxu0 %v1375_v19  ;;  %1430 = vmatpush1.bf16.msra.mxu1 %v1407_v20 }
 0x3c8   :  { %1378 = vmatprep.subr.bf16.mxu0 %v1377_v24  ;;  %1423 = vmatprep.subr.bf16.mxu1 %v1409_v25 }
 0x3cb   :  { %1380 = vmatpush1.bf16.msra.mxu0 %v1379_v34  ;;  %1431 = vmatpush1.bf16.msra.mxu1 %v1411_v36 }
 0x3cc   :  { %1382 = vmatprep.subr.bf16.mxu0 %v1381_v39  ;;  %1424 = vmatprep.subr.bf16.mxu1 %v1413_v40 }
 0x3cf   :  { %1384 = vmatpush1.bf16.msra.mxu0 %v1383_v44  ;;  %1432 = vmatpush1.bf16.msra.mxu1 %v1415_v46 }
 0x3d0   :  { %1386 = vmatprep.subr.bf16.mxu0 %v1723_v3  ;;  %v620_v3 = vlaneseq }
 0x3d2   :  { %879 = vmatmul.mubr.f32.vlgmr.msra.gmra.mrb[8].mxu0 %v1733_v22  ;;  %962 = vmatmul.mubr.f32.vlgmr.msra.gmra.mrb[8].mxu1 %v1742_v35 }
 0x3d3   :  { %1388 = vmatpush1.bf16.msra.mxu0 %v1731_v18  ;;  %884 = vmatprep.mubr.f32.mxu0 %v1569_v4 }
 0x3d4   :  { %1390 = vmatprep.subr.bf16.mxu0 %v1735_v27 }
 0x3d6   :  { %885 = vmatmul.mubr.f32.gmra.mrb[10].mxu0 %v1742_v35 }
 0x3d7   :  { %1392 = vmatpush1.bf16.msra.mxu0 %v1740_v32  ;;  %955 = vmatprep.mubr.f32.mxu0 %v1569_v4  ;;  %v621_v4 = vshrl.u32 %v620_v3, 7  ;;  %v618_v32 = vld [vmem:[%s1810_s10] sm:$0xff]  ;;  %s1570_s10 = smov [#allocation10]  }
 0x3d8   :  { %1394 = vmatprep.subr.bf16.mxu0 %v1746_v37  ;;  %s1005_s19 = sshll.u32 %s1570_s10, 4  ;;  %s1006_s19 = int_to_ptr.vmem [resolvable:$true] %s1005_s19 }
 0x3d9   :  { %v622_v18 = vsub.s32 0, %v621_v4  ;;  %v630_v27 = vsub.s32 2, %v621_v4  ;;  %v626_v35 = vsub.s32 1, %v621_v4  ;;  %v634_v37 = vsub.s32 3, %v621_v4  ;;  %s1531_s21 = scalar_lea.vmem %s1006_s19, 2048  ;;  %p1536_p5 = scmp.lt.s32.totalorder %s1006_s19, %s1006_s19 }
 0x3da   :  { %v646_v12 = vsub.s32 6, %v621_v4  ;;  %v642_v13 = vsub.s32 5, %v621_v4  ;;  %v650_v14 = vsub.s32 7, %v621_v4  ;;  %p1532_p4 = scmp.ne.s32.totalorder %s1006_s19, %s1531_s21  ;;  %p1537_p6 = scmp.lt.s32.totalorder %s1531_s21, %s1531_s21 }
 0x3db   :  { %1396 = vmatpush1.bf16.msra.mxu0 %v1752_v45  ;;  %v623_v45 = vrot.slane %v618_v32, %v622_v18  ;;  %v631_v47 = vrot.slane %v618_v32, %v630_v27  ;;  %v627_v48 = vrot.slane %v618_v32, %v626_v35 }
 0x3dc   :  { %1398 = vmatprep.subr.bf16.mxu0 %v1755_v49  ;;  %v635_v49 = vrot.slane %v618_v32, %v634_v37  ;;  %v647_v16 = vrot.slane %v618_v32, %v646_v12  ;;  %v643_v17 = vrot.slane %v618_v32, %v642_v13  ;;  %v651_v19 = vrot.slane %v618_v32, %v650_v14  ;;  %p1538_p7 = por %p1537_p6, %p1536_p5 }
 0x3de   :  { %p1539_p8 = pnand %p1538_p7, %p1532_p4 }
 0x3df   :  { %1400 = vmatpush1.bf16.msra.mxu0 %v1760_v57 }
 0x3e0   :  { %1402 = vmatprep.subr.bf16.mxu0 %v1763_v61 }
 0x3e3   :  { %1404 = vmatpush1.bf16.msra.mxu0 %v1403_v7 }
 0x3e4   :  { %1406 = vmatprep.subr.bf16.mxu0 %v1405_v11  ;;  %v638_v11 = vsub.s32 4, %v621_v4 }
 0x3e6   :  { %v639_v15 = vrot.slane %v618_v32, %v638_v11 }
 0x3e7   :  { %1408 = vmatpush1.bf16.msra.mxu0 %v1407_v20 }
 0x3e8   :  { %1410 = vmatprep.subr.bf16.mxu0 %v1409_v25 }
 0x3eb   :  { %1412 = vmatpush1.bf16.msra.mxu0 %v1411_v36 }
 0x3ec   :  { %1414 = vmatprep.subr.bf16.mxu0 %v1413_v40 }
 0x3ef   :  { %1416 = vmatpush1.bf16.msra.mxu0 %v1415_v46 }
 0x3f2   :  { %956 = vmatmul.mubr.f32.vlgmr.msra.gmra.mrb[12].mxu0 %v1733_v22 }
 0x485   :  { %v726_v50 = vpop.f32.mrb[4].mxu0  ;;  %v803_v51 = vpop.f32.mrb[4].mxu1 }
 0x486   :  { %v727_v52 = vadd.f32 %v726_v50, %v623_v45  ;;  %v804_v53 = vadd.f32 %v803_v51, %v631_v47  ;;  %v728_v54 = vpop.f32.mrb[5].mxu0  ;;  %v805_v22 = vpop.f32.mrb[5].mxu1 }
 0x487   :  { %v729_v55 = vadd.f32 %v728_v54, %v627_v48  ;;  %v806_v56 = vadd.f32 %v805_v22, %v635_v49 }
 0x488   :  { %v968_v57 = vmax.f32 %v727_v52, 0.0  ;;  %v970_v58 = vmax.f32 %v804_v53, 0.0 }
 0x489   :  { %v969_v59 = vmax.f32 %v729_v55, 0.0  ;;  %v971_v60 = vmax.f32 %v806_v56, 0.0  ;;  %v732_v61 = vpop.f32.mrb[6].mxu0  ;;  %v809_v62 = vpop.f32.mrb[6].mxu1 }
 0x48a   :  { %984 = vst [vmem:[#allocation10] sm:$0xff] %v968_v57  ;;  %986 = vst [vmem:[#allocation10 + $0x10] sm:$0xff] %v970_v58  ;;  %v733_v63 = vadd.f32 %v732_v61, %v623_v45  ;;  %v810_v0 = vadd.f32 %v809_v62, %v631_v47  ;;  %v734_v1 = vpop.f32.mrb[7].mxu0  ;;  %v811_v2 = vpop.f32.mrb[7].mxu1 }
 0x48b   :  { %985 = vst [vmem:[#allocation10 + $0x8] sm:$0xff] %v969_v59  ;;  %987 = vst [vmem:[#allocation10 + $0x18] sm:$0xff] %v971_v60  ;;  %v735_v5 = vadd.f32 %v734_v1, %v627_v48  ;;  %v812_v6 = vadd.f32 %v811_v2, %v635_v49 }
 0x48c   :  { %v976_v7 = vmax.f32 %v733_v63, 0.0  ;;  %v978_v8 = vmax.f32 %v810_v0, 0.0 }
 0x48d   :  { %v977_v9 = vmax.f32 %v735_v5, 0.0  ;;  %v979_v10 = vmax.f32 %v812_v6, 0.0 }
 0x48e   :  { %992 = vst [vmem:[#allocation10 + $0x40] sm:$0xff] %v976_v7  ;;  %994 = vst [vmem:[#allocation10 + $0x50] sm:$0xff] %v978_v8 }
 0x48f   :  { %993 = vst [vmem:[#allocation10 + $0x48] sm:$0xff] %v977_v9  ;;  %995 = vst [vmem:[#allocation10 + $0x58] sm:$0xff] %v979_v10 }
 0x4a5   :  { %v880_v20 = vpop.f32.mrb[8].mxu0  ;;  %v963_v21 = vpop.f32.mrb[8].mxu1 }
 0x4a6   :  { %v881_v23 = vadd.f32 %v880_v20, %v639_v15  ;;  %v964_v24 = vadd.f32 %v963_v21, %v647_v16  ;;  %v882_v25 = vpop.f32.mrb[9].mxu0  ;;  %v965_v26 = vpop.f32.mrb[9].mxu1 }
 0x4a7   :  { %v883_v28 = vadd.f32 %v882_v25, %v643_v17  ;;  %v966_v29 = vadd.f32 %v965_v26, %v651_v19 }
 0x4a8   :  { %v972_v30 = vmax.f32 %v881_v23, 0.0  ;;  %v982_v31 = vmax.f32 %v964_v24, 0.0 }
 0x4a9   :  { %v973_v33 = vmax.f32 %v883_v28, 0.0  ;;  %v983_v34 = vmax.f32 %v966_v29, 0.0  ;;  %v886_v36 = vpop.f32.mrb[10].mxu0 }
 0x4aa   :  { %988 = vst [vmem:[#allocation10 + $0x20] sm:$0xff] %v972_v30  ;;  %998 = vst [vmem:[#allocation10 + $0x70] sm:$0xff] %v982_v31  ;;  %v887_v38 = vadd.f32 %v886_v36, %v639_v15  ;;  %v888_v39 = vpop.f32.mrb[11].mxu0 }
 0x4ab   :  { %989 = vst [vmem:[#allocation10 + $0x28] sm:$0xff] %v973_v33  ;;  %999 = vst [vmem:[#allocation10 + $0x78] sm:$0xff] %v983_v34  ;;  %v889_v40 = vadd.f32 %v888_v39, %v643_v17 }
 0x4ac   :  { %v980_v41 = vmax.f32 %v887_v38, 0.0 }
 0x4ad   :  { %v981_v42 = vmax.f32 %v889_v40, 0.0 }
 0x4ae   :  { %996 = vst [vmem:[#allocation10 + $0x60] sm:$0xff] %v980_v41 }
 0x4af   :  { %997 = vst [vmem:[#allocation10 + $0x68] sm:$0xff] %v981_v42 }
 0x4c5   :  { %v957_v43 = vpop.f32.mrb[12].mxu0 }
 0x4c6   :  { %v958_v44 = vadd.f32 %v957_v43, %v647_v16  ;;  %v959_v46 = vpop.f32.mrb[13].mxu0 }
 0x4c7   :  { %v960_v3 = vadd.f32 %v959_v46, %v651_v19 }
 0x4c8   :  { %v974_v4 = vmax.f32 %v958_v44, 0.0 }
 0x4c9   :  { %v975_v18 = vmax.f32 %v960_v3, 0.0 }
 0x4ca   :  { %990 = vst [vmem:[#allocation10 + $0x30] sm:$0xff] %v974_v4 }
 0x4cb   :  { %991 = vst [vmem:[#allocation10 + $0x38] sm:$0xff] %v975_v18 }
 0x4cc   :  { %1542 = shalt.err (!%p1539_p8)
}
 0x4cd   :  { %s1543_s5 = scalar_lea.hbm %s1811_s11, 2048 }
 0x4ce   :  { %p1544_p9 = scmp.ne.s32.totalorder %s1811_s11, %s1543_s5  ;;  %p1547_p10 = scmp.lt.u32.totalorder %s1543_s5, %s1811_s11 }
 0x4d0   :  { %p1549_p11 = pnand %p1547_p10, %p1544_p9 }
 0x4d2   :  { %1552 = shalt.err (!%p1549_p11)
}
 0x4d3   :  { %1011 = dma.vmem_to_hbm [thread:$0]  %s1006_s19, 2048, %s1811_s11, [#allocation4], %s1567_s7, %s1567_s7, %s1568_s29  }
 0x4d4   :  { %1559 = dma.done.wait [#allocation4], 2048  }
 0x4d5   :  { %1560 = vsyncadd [#allocation4], 4294965248 }
 0x4d6   :  { %1015 = vsyncpa [#allocation3], 1 }
 0x4d7   :  { %1016 = vsyncpa [#allocation6], 1 }
 0x4d8   :  { %1017 = vsyncpa [#allocation9], 1 }
 0x4d9   :  { %1018 = vsyncpa [#allocation4], 1 }

</bundles_post_ra>
